<compile_context>
chip_gen: v7x
topology: tpu7x:2x2x1
jax: 0.10.0
libtpu: 0.0.40
codegen_flags: <defaults>
</compile_context>

<pallas_src>
import functools

import jax
import jax.numpy as jnp
import numpy as np
from jax.experimental import pallas as pl
from jax.experimental.pallas import tpu as pltpu


def _round_up(x, m):
    return ((x + m - 1) // m) * m


# ----------------------------------------------------------------------------
# Window helpers (host-side numpy, computed once at module construction)
# ----------------------------------------------------------------------------
def build_window(kernel_size, window_fn="hann"):
    if window_fn == "hann":
        n = np.arange(kernel_size)
        return 0.5 * (1.0 - np.cos(2.0 * np.pi * n / kernel_size))  # periodic hann
    # TODO(synk): only the default 'hann' window of build_window is implemented.
    raise NotImplementedError(f"window_fn={window_fn!r}")


def build_optimal_window(window, hop_size):
    """WOLA / COLA-normalized synthesis window: window / sum_shifts window_shifted^2."""
    kernel_size = window.shape[0]
    n_shifts = kernel_size // hop_size
    idx = (np.arange(kernel_size)[None, :] - hop_size * np.arange(n_shifts)[:, None]) % kernel_size
    norm = np.sum(window[idx] ** 2, axis=0)
    return window / norm


# ----------------------------------------------------------------------------
# Pallas kernel: one fused MXU contraction per (batch, time-tile)
# ----------------------------------------------------------------------------
def _decoder_tile_kernel(w_ref, x_ref, o_ref):
    # w_ref: (CoS_pad, K_tot)  bf16  (grid-invariant -> stays VMEM resident)
    # x_ref: (1, K_tot, TM)    bf16  (pre-shifted / channel-stacked frames)
    # o_ref: (1, CoS_pad, TM)  f32   (lane axis = time -> dense stores)
    o_ref[0] = jnp.dot(w_ref[...], x_ref[0], preferred_element_type=jnp.float32)


def conv_transpose1d_pallas(x, weight, stride, *, tile_m=512, interpret=False):
    """Equivalent of F.conv_transpose1d(x, weight, stride=stride, bias=None).

    x      : (B, Cin, L)     float32 (NCL, PyTorch convention)
    weight : (Cin, Cout, K)  float32 (PyTorch conv_transpose1d weight layout)
    returns: (B, Cout, (L-1)*stride + K)  float32
    """
    B, Cin, L = x.shape
    Cin_w, Cout, K = weight.shape
    assert Cin == Cin_w
    s = int(stride)
    d = -(-K // s)                       # ceil(K / stride): number of overlapping taps
    Kp = d * s
    M = L + d - 1                        # number of output "frames" (time blocks of width s)
    T_out = (L - 1) * s + K
    CoS = Cout * s

    # --- glue: regroup weight to (CoS, d*Cin):  W2[co*s+r, j*Cin+ci] = W[ci, co, j*s+r] ---
    w_pad = jnp.pad(weight, ((0, 0), (0, 0), (0, Kp - K)))
    w2 = jnp.transpose(w_pad.reshape(Cin, Cout, d, s), (1, 3, 2, 0)).reshape(CoS, d * Cin)

    # --- glue: pre-materialize the d shifted frame copies (fused contraction operand) ---
    # X[b, j*Cin+ci, m] = x[b, ci, m - j]   (zero outside [0, L))
    x_stacked = jnp.concatenate(
        [jnp.pad(x, ((0, 0), (0, 0), (j, d - 1 - j))) for j in range(d)], axis=1)

    # --- padding for clean TPU layouts ---
    K_raw = d * Cin
    K_tot = _round_up(K_raw, 16)         # bf16-friendly contraction width
    CoS_pad = _round_up(CoS, 16)

    # Pick a time tile (multiple of 128) under a conservative VMEM budget (v7x: 64 MiB physical).
    budget = 24 << 20
    TM = 128
    for cand in (1024, 512, 256, 128):
        if cand > tile_m:
            continue
        need = 2 * (K_tot * cand * 2 + CoS_pad * cand * 4) + CoS_pad * K_tot * 2
        if need <= budget:
            TM = cand
            break
    TM = min(TM, _round_up(M, 128))
    M_pad = _round_up(M, TM)

    x_stacked = jnp.pad(x_stacked, ((0, 0), (0, K_tot - K_raw), (0, M_pad - M)))
    w2 = jnp.pad(w2, ((0, CoS_pad - CoS), (0, K_tot - K_raw)))

    # bf16 operands, f32 accumulation (loose decoder tolerance makes this safe)
    x_bf = x_stacked.astype(jnp.bfloat16)
    w_bf = w2.astype(jnp.bfloat16)

    grid = (B, M_pad // TM)
    out_t = pl.pallas_call(
        _decoder_tile_kernel,
        out_shape=jax.ShapeDtypeStruct((B, CoS_pad, M_pad), jnp.float32),
        grid_spec=pltpu.PrefetchScalarGridSpec(
            num_scalar_prefetch=0,
            grid=grid,
            in_specs=[
                pl.BlockSpec((CoS_pad, K_tot), lambda b, t: (0, 0)),   # resident weight
                pl.BlockSpec((1, K_tot, TM), lambda b, t: (b, 0, t)),
            ],
            out_specs=pl.BlockSpec((1, CoS_pad, TM), lambda b, t: (b, 0, t)),
        ),
        compiler_params=pltpu.CompilerParams(
            dimension_semantics=("parallel", "parallel"),
            vmem_limit_bytes=32 * 1024 * 1024,
        ),
        interpret=interpret,
    )(w_bf, x_bf)

    # --- glue: (B, Cout*s, M) -> (B, Cout, M*s) interleave, crop to conv_transpose length ---
    out_t = out_t[:, :CoS, :M]
    out = jnp.transpose(out_t.reshape(B, Cout, s, M), (0, 1, 3, 2)).reshape(B, Cout, M * s)
    return out[:, :, :T_out]


# ----------------------------------------------------------------------------
# FourierDecoder weight construction (hoisted out of forward)
# ----------------------------------------------------------------------------
def _fourier_conv_transpose_weight(n_basis, kernel_size, stride, window_fn="hann",
                                   onesided=True, phase=None):
    """Returns the conv_transpose1d weight (Cin, 1, K) for the channel-stacked [real | imag]
    input.  For onesided=True the input mirroring of the PyTorch forward is folded into the
    weight (interior bins doubled), so Cin = n_basis + 2; otherwise Cin = 2 * n_basis."""
    omega = 2.0 * np.pi * np.arange(n_basis // 2 + 1) / n_basis
    n = np.arange(kernel_size)
    omega_n = omega[:, None] * n[None, :]
    if phase is not None:
        omega_n = omega_n + np.asarray(phase, dtype=np.float64)[:, None]
    br = np.cos(omega_n)                                   # (n_basis//2+1, K)
    bi = np.sin(omega_n)
    window = build_window(kernel_size, window_fn=window_fn)
    ow = build_optimal_window(window, hop_size=stride)

    if onesided:
        scale = np.ones(n_basis // 2 + 1)
        scale[1:n_basis // 2] = 2.0                        # folded hermitian mirroring
        w_real = scale[:, None] * ow[None, :] * br / n_basis
        w_imag = scale[:, None] * ow[None, :] * bi / n_basis
    else:
        br_full = np.concatenate([br, np.flip(br[1:n_basis // 2], axis=0)], axis=0)
        bi_full = np.concatenate([bi, -np.flip(bi[1:n_basis // 2], axis=0)], axis=0)
        w_real = ow[None, :] * br_full / n_basis
        w_imag = ow[None, :] * bi_full / n_basis

    w = np.concatenate([w_real, -w_imag], axis=0)[:, None, :]   # (Cin, 1, K)
    return jnp.asarray(w, jnp.float32)


class FourierDecoderPallas:
    """JAX/Pallas equivalent of FourierDecoder.forward (fixed-parameter path)."""

    # TODO(synk): trainable / trainable_phase gradient updates are a training concern; this
    # implements the forward pass with the (optionally phase-shifted) fixed parameters.
    def __init__(self, n_basis, kernel_size, stride=None, window_fn="hann",
                 onesided=True, phase=None):
        assert stride is not None
        self.n_basis = n_basis
        self.kernel_size = kernel_size
        self.stride = stride
        self.onesided = onesided
        # Basis / optimal-window build hoisted out of forward(): computed once here.
        self.weight = _fourier_conv_transpose_weight(
            n_basis, kernel_size, stride, window_fn=window_fn,
            onesided=onesided, phase=phase)
        self._conv = jax.jit(functools.partial(conv_transpose1d_pallas, stride=stride))

    def __call__(self, x):
        return self.forward(x)

    def forward(self, x):
        """x: complex (B, nb, n_frames) or real (B, 2*nb, n_frames) with [real | imag] channels,
        where nb = n_basis//2+1 if onesided else n_basis.  Returns (B, 1, (n_frames-1)*s + K)."""
        if jnp.iscomplexobj(x):
            x_real, x_imag = jnp.real(x), jnp.imag(x)
        else:
            n_bins = x.shape[1]
            x_real, x_imag = x[:, : n_bins // 2, :], x[:, n_bins // 2:, :]
        expected = self.n_basis // 2 + 1 if self.onesided else self.n_basis
        assert x_real.shape[1] == expected
        xin = jnp.concatenate([x_real, x_imag], axis=1)
        return self._conv(xin, self.weight)


# ----------------------------------------------------------------------------
# plain-JAX reference (literal translation of the PyTorch forward) for checking
# ----------------------------------------------------------------------------
def conv_transpose1d_ref(x, weight, stride):
    B, Cin, L = x.shape
    _, Cout, K = weight.shape
    T = (L - 1) * stride + K
    out = jnp.zeros((B, Cout, T), jnp.float32)
    for l in range(L):
        contrib = jnp.einsum("bc,cok->bok", x[:, :, l], weight)
        out = out.at[:, :, l * stride:l * stride + K].add(contrib)
    return out


def fourier_decoder_ref(x, n_basis, kernel_size, stride, onesided, phase=None):
    if jnp.iscomplexobj(x):
        x_real, x_imag = jnp.real(x), jnp.imag(x)
    else:
        n_bins = x.shape[1]
        x_real, x_imag = x[:, : n_bins // 2, :], x[:, n_bins // 2:, :]
    omega = 2.0 * np.pi * np.arange(n_basis // 2 + 1) / n_basis
    n = np.arange(kernel_size)
    omega_n = omega[:, None] * n[None, :]
    if phase is not None:
        omega_n = omega_n + np.asarray(phase, dtype=np.float64)[:, None]
    br = np.cos(omega_n)[:, None, :]
    bi = np.sin(omega_n)[:, None, :]
    br_c, bi_c = np.flip(br[1:n_basis // 2], axis=0), np.flip(bi[1:n_basis // 2], axis=0)
    br = np.concatenate([br, br_c], axis=0)
    bi = np.concatenate([bi, -bi_c], axis=0)
    ow = build_optimal_window(build_window(kernel_size), hop_size=stride)
    br = jnp.asarray(ow[None, None, :] * br / n_basis, jnp.float32)
    bi = jnp.asarray(ow[None, None, :] * bi / n_basis, jnp.float32)
    if onesided:
        rc = jnp.flip(x_real[:, 1:n_basis // 2, :], axis=1)
        ic = jnp.flip(x_imag[:, 1:n_basis // 2, :], axis=1)
        x_real = jnp.concatenate([x_real, rc], axis=1)
        x_imag = jnp.concatenate([x_imag, -ic], axis=1)
    return (conv_transpose1d_ref(x_real, br, stride)
            - conv_transpose1d_ref(x_imag, bi, stride))


if __name__ == "__main__":
    key = jax.random.PRNGKey(0)
    k1, k2 = jax.random.split(key)

    B, n_basis, kernel_size, stride, n_frames = 2, 64, 64, 16, 8
    T_expected = (n_frames - 1) * stride + kernel_size

    # ---------------- onesided=True (module default), real [real|imag] input ----------------
    dec1 = FourierDecoderPallas(n_basis, kernel_size, stride=stride, onesided=True)
    x1 = jax.random.normal(k1, (B, 2 * (n_basis // 2 + 1), n_frames), jnp.float32)
    out1 = jax.block_until_ready(dec1(x1))
    assert out1.shape == (B, 1, T_expected)
    ref1 = fourier_decoder_ref(x1, n_basis, kernel_size, stride, onesided=True)
    np.testing.assert_allclose(np.asarray(out1), np.asarray(ref1), rtol=3e-2, atol=3e-2)

    # ---------------- onesided=False ----------------
    dec2 = FourierDecoderPallas(n_basis, kernel_size, stride=stride, onesided=False)
    x2 = jax.random.normal(k2, (B, 2 * n_basis, n_frames), jnp.float32)
    out2 = jax.block_until_ready(dec2(x2))
    assert out2.shape == (B, 1, T_expected)
    ref2 = fourier_decoder_ref(x2, n_basis, kernel_size, stride, onesided=False)
    np.testing.assert_allclose(np.asarray(out2), np.asarray(ref2), rtol=3e-2, atol=3e-2)

    print("KERNEL_OK")
</pallas_src>

<mosaic_0001>
module attributes {stable_mosaic.version = 11 : i64} {
  func.func @_decoder_tile_kernel(%arg0: i32, %arg1: i32, %arg2: memref<16x272xbf16, #tpu.memory_space<vmem>>, %arg3: memref<1x272x128xbf16, #tpu.memory_space<vmem>>, %arg4: memref<1x16x128xf32, #tpu.memory_space<vmem>>) attributes {dimension_semantics = [#tpu.dimension_semantics<parallel>, #tpu.dimension_semantics<parallel>], iteration_bounds = array<i64: 2, 1>, scalar_prefetch = 0 : i64, scratch_operands = 0 : i64, tpu.core_type = #tpu.core_type<tc>, window_params = [{pipeline_mode = #tpu.pipeline_mode<synchronous>, transform_indices = @transform_0, window_bounds = array<i64: 16, 272>}, {transform_indices = @transform_1, window_bounds = array<i64: 1, 272, 128>}, {transform_indices = @transform_2, window_bounds = array<i64: 1, 16, 128>}]} {
    %c0 = arith.constant 0 : index
    %c0_0 = arith.constant 0 : index
    %0 = vector.load %arg2[%c0, %c0_0] : memref<16x272xbf16, #tpu.memory_space<vmem>>, vector<16x272xbf16>
    %c0_1 = arith.constant 0 : index
    %c0_2 = arith.constant 0 : index
    %c0_3 = arith.constant 0 : index
    %1 = vector.load %arg3[%c0_1, %c0_2, %c0_3] : memref<1x272x128xbf16, #tpu.memory_space<vmem>>, vector<1x272x128xbf16>
    %2 = vector.shape_cast %1 : vector<1x272x128xbf16> to vector<272x128xbf16>
    %cst = arith.constant dense<0.000000e+00> : vector<16x128xf32>
    %3 = tpu.matmul %0, %2, %cst {dimension_numbers = #tpu.dot_dimension_numbers<[1], [0], [0], [1], [0, 0, 1, 1], [], []>} : vector<16x272xbf16>, vector<272x128xbf16>, vector<16x128xf32> -> vector<16x128xf32>
    %c0_4 = arith.constant 0 : index
    %c0_5 = arith.constant 0 : index
    %c0_6 = arith.constant 0 : index
    %4 = vector.load %arg4[%c0_4, %c0_5, %c0_6] : memref<1x16x128xf32, #tpu.memory_space<vmem>>, vector<1x16x128xf32>
    %5 = vector.shape_cast %4 : vector<1x16x128xf32> to vector<16x128xf32>
    %6 = vector.shape_cast %3 : vector<16x128xf32> to vector<1x16x128xf32>
    tpu.vector_store %arg4[%c0_4, %c0_5, %c0_6], %6 {strides = array<i32>} : memref<1x16x128xf32, #tpu.memory_space<vmem>>, vector<1x16x128xf32>,
    return
  }
  func.func @transform_0(%arg0: i32, %arg1: i32) -> (i32, i32) {
    %c0_i32 = arith.constant 0 : i32
    %c0_i32_0 = arith.constant 0 : i32
    %c0_i32_1 = arith.constant 0 : i32
    return %c0_i32, %c0_i32_0 : i32, i32
  }
  func.func @transform_1(%arg0: i32, %arg1: i32) -> (i32, i32, i32) {
    %c0_i32 = arith.constant 0 : i32
    %c0_i32_0 = arith.constant 0 : i32
    return %arg0, %c0_i32, %arg1 : i32, i32, i32
  }
  func.func @transform_2(%arg0: i32, %arg1: i32) -> (i32, i32, i32) {
    %c0_i32 = arith.constant 0 : i32
    %c0_i32_0 = arith.constant 0 : i32
    return %arg0, %c0_i32, %arg1 : i32, i32, i32
  }
}

</mosaic_0001>

<bundles_post_ra>
// kernel: conv_transpose1d_pallas.1
= control target key start
LH: loop header
LB: loop body
LE: loop exit
PB: predicated region body
PF: predicated region fallthrough
CT: control target
= control target key end

     0   :  { %s653_s9 = smov 0   ;;  %s655_s10 = smov 0   ;;  %s718_s0 = inlined_call_operand.vmem [shape: bf16[16,272], index: 0, kind: input, shape index: {}]   ;;  %s719_s1 = inlined_call_operand.vmem [shape: bf16[2,272,128], index: 1, kind: input, shape index: {}]   ;;  %s720_s2 = inlined_call_operand.vmem [shape: f32[2,16,128], index: 2, kind: output, shape index: {}]  }
   0x1   :  { %s657_s11 = smov 0  }
   0x2 LB: > { %s24_s12 = sadd.s32 1, %s630_s10  ;;  %p506_p0 = scmp.ge.s32.totalorder %s634_s11, 1  ;;  %s634_s11 = sphi %s657_s11, %s12_s11   ;;  %s630_s10 = sphi %s655_s10, %s722_s10   ;;  %s626_s9 = sphi %s653_s9, %s721_s9  }
   0x3   : > { %p26_p1 = scmp.ge.s32.totalorder %s24_s12, 2  ;;  %p131_p2 = scmp.lt.s32.totalorder %s634_s11, 3 }
   0x5   : > { %s724_s12 = smov (%p26_p1, %s24_s12), 0  ;;  %p132_p3 = pnand %p506_p0, %p131_p2 }
   0x6   : > { %p159_p4 = scmp.lt.s32.totalorder (!%p132_p3), %s626_s9, 1  ;;  %v636_v0 = vmov (!%p132_p3), 0.0   ;;  %v610_v1 = vld [vmem:[%s718_s0 + $0x4] ss:$12 sps:$4 sm:$0xff] (!%p132_p3)   ;;  %vm637_vm0 = vmmov (!%p132_p3), 0   ;;  %vm331_vm1 = vcmask (!%p132_p3), 130048  }
   0x7   : > { %135 = sbr.rel (%p132_p3) target bundleno = 271 (0x10f), region = 28  ;;  %558 = vmatprep.subr.bf16.mxu1 (!%p132_p3), %v636_v0  ;;  %560 = vmatprep.mubr.msk.bf16.mxu1 (!%p132_p3), %vm637_vm0, %v636_v0  ;;  %v611_v14 = vld [vmem:[%s718_s0 + $0x8] ss:$12 sps:$4 sm:$0xff] (!%p132_p3)   ;;  %v608_v20 = vld [vmem:[%s718_s0] ss:$12 sps:$4 sm:$0xff] (!%p132_p3)  }
   0x8   : > { %367 = vmatprep.mubr.bf16.mxu0 (!%p132_p3), %v610_v1 }
   0xe   : > { %s726_s9 = smov (!%p159_p4, %s626_s9), 1 }
   0xf   : > { %s564_s15 = smul.u32 136, %s726_s9  ;;  %s533_s23 = sshll.u32 %s726_s9, 4 }
  0x10   : > { %s174_s26 = scalar_lea.vmem %s720_s2, %s533_s23 }
  0x11   : > { %s680_s18 = scalar_lea.vmem %s719_s1, %s564_s15 }
  0x12   : > { %v591_v2 = vld [vmem:[%s680_s18 + $0x40] sm:$0xff]   ;;  %v593_v4 = vld [vmem:[%s680_s18 + $0x48] sm:$0xff]   ;;  %v595_v6 = vld [vmem:[%s680_s18 + $0x50] sm:$0xff]  }
  0x13   : > { %v592_v3 = vld [vmem:[%s680_s18] sm:$0xff]   ;;  %534 = vmatprep.subr.bf16.mxu0 %v591_v2  ;;  %v594_v5 = vld [vmem:[%s680_s18 + $0x8] sm:$0xff]   ;;  %v596_v7 = vld [vmem:[%s680_s18 + $0x10] sm:$0xff]  }
  0x14   : > { %535 = vmatpush3.bf16.msra.mxu0 %v592_v3  ;;  %v597_v8 = vld [vmem:[%s680_s18 + $0x58] sm:$0xff]   ;;  %v599_v10 = vld [vmem:[%s680_s18 + $0x60] sm:$0xff]   ;;  %v601_v12 = vld [vmem:[%s680_s18 + $0x68] sm:$0xff]  }
  0x15   : > { %536 = vmatprep.subr.bf16.mxu0 %v593_v4  ;;  %v598_v9 = vld [vmem:[%s680_s18 + $0x18] sm:$0xff]   ;;  %v600_v11 = vld [vmem:[%s680_s18 + $0x20] sm:$0xff]   ;;  %v602_v15 = vld [vmem:[%s680_s18 + $0x28] sm:$0xff]  }
  0x16   : > { %v607_v13 = vld [vmem:[%s680_s18 + $0x80] sm:$0xff]   ;;  %v603_v16 = vld [vmem:[%s680_s18 + $0x70] sm:$0xff]   ;;  %v605_v18 = vld [vmem:[%s680_s18 + $0x78] sm:$0xff]  }
  0x17   : > { %559 = vmatpush3.bf16.msra.mxu1 %v607_v13  ;;  %v604_v17 = vld [vmem:[%s680_s18 + $0x30] sm:$0xff]   ;;  %v606_v19 = vld [vmem:[%s680_s18 + $0x38] sm:$0xff]  }
  0x18   : > { %537 = vmatpush3.bf16.msra.mxu0 %v594_v5 }
  0x19   : > { %538 = vmatprep.subr.bf16.mxu0 %v595_v6 }
  0x1a   : > { %561 = vmatmul.mubr.msk.bf16.vlgmr.msra.gmra.mrb[0].mxu1 %vm331_vm1, %v611_v14 }
  0x1c   : > { %539 = vmatpush3.bf16.msra.mxu0 %v596_v7 }
  0x1d   : > { %540 = vmatprep.subr.bf16.mxu0 %v597_v8 }
  0x20   : > { %541 = vmatpush3.bf16.msra.mxu0 %v598_v9 }
  0x21   : > { %542 = vmatprep.subr.bf16.mxu0 %v599_v10 }
  0x24   : > { %543 = vmatpush3.bf16.msra.mxu0 %v600_v11 }
  0x25   : > { %544 = vmatprep.subr.bf16.mxu0 %v601_v12 }
  0x28   : > { %545 = vmatpush3.bf16.msra.mxu0 %v602_v15 }
  0x29   : > { %546 = vmatprep.subr.bf16.mxu0 %v603_v16 }
  0x2c   : > { %547 = vmatpush3.bf16.msra.mxu0 %v604_v17 }
  0x2d   : > { %548 = vmatprep.subr.bf16.mxu0 %v605_v18 }
  0x30   : > { %549 = vmatpush3.bf16.msra.mxu0 %v606_v19 }
  0x33   : > { %368 = vmatmul.mubr.bf16.vlgmr.msra.gmra.mrb[0].mxu0 %v608_v20 }
  0xed   : > { %v410_v21 = vpop.f32.mrb[0].mxu1 }
  0xee   : > { %v562_v22 = vpop.f32.mrb[1].mxu1 }
  0xef   : > { %v413_v23 = vpop.f32.mrb[2].mxu1 }
  0xf0   : > { %v563_v24 = vpop.f32.mrb[3].mxu1 }
 0x106   : > { %v550_v25 = vpop.f32.mrb[0].mxu0 }
 0x107   : > { %v551_v26 = vpop.f32.mrb[1].mxu0 }
 0x108   : > { %v552_v27 = vadd.f32 %v551_v26, %v550_v25  ;;  %v553_v28 = vpop.f32.mrb[2].mxu0 }
 0x109   : > { %v554_v29 = vpop.f32.mrb[3].mxu0 }
 0x10a   : > { %v411_v30 = vadd.f32 %v552_v27, %v410_v21  ;;  %v555_v31 = vadd.f32 %v554_v29, %v553_v28 }
 0x10c   : > { %417 = vst [vmem:[%s174_s26] sm:$0xff] %v411_v30  ;;  %v414_v32 = vadd.f32 %v555_v31, %v413_v23 }
 0x10e   : > { %418 = vst [vmem:[%s174_s26 + $0x8] sm:$0xff] %v414_v32 }
 0x10f PF: > { %s12_s11 = sadd.s32 1, %s634_s11   ;;  %s721_s9 = smov %s630_s10 }
 0x110   : > { %p9_p5 = scmp.ge.s32.totalorder %s12_s11, 4   ;;  %s722_s10 = smov %s724_s12 }
 0x112   :  { %11 = sbr.rel (!%p9_p5) target bundleno = 2 (0x2), region = 58 }

</bundles_post_ra>
